<compile_context>
chip_gen: v5e
topology: v5e:2x2
jax: 0.10.0
libtpu: 0.0.40
codegen_flags: <defaults>
</compile_context>

<pallas_src>
import jax
import jax.numpy as jnp
from jax.experimental import pallas as pl
from jax.experimental.pallas import tpu as pltpu


def _round_up(x, m):
    return (x + m - 1) // m * m


def mf_kernel(Ut_ref, Vt_ref, bu_ref, bv_ref, out_ref):
    # Ut_ref, Vt_ref: (E, TB)   bu_ref, bv_ref, out_ref: (1, TB)
    prod = Ut_ref[...] * Vt_ref[...]                      # VPU elementwise (bf16 ok on v6e/v7x)
    # Accumulate in float32 regardless of the storage dtype.
    dot = jnp.sum(prod.astype(jnp.float32), axis=0, keepdims=True)   # sublane reduce -> (1, TB)
    acc = dot + bu_ref[...].astype(jnp.float32) + bv_ref[...].astype(jnp.float32)
    out_ref[...] = acc.astype(out_ref.dtype)              # lane-dense (1, TB) store


def mf_forward(u, v, user_emb, item_emb, user_bias, item_bias, *, block_b=512):
    """Compute (user_emb[u] * item_emb[v]).sum(1) + user_bias[u] + item_bias[v]."""
    B = u.shape[0]
    E = user_emb.shape[1]
    out_dtype = user_emb.dtype
    itemsize = jnp.dtype(user_emb.dtype).itemsize

    # --- tile sizing ---
    # Double-buffered input working set = 2 inputs x 2 buffers x E x block_b x itemsize.
    # Keep it under ~12 MiB: fits the 16 MiB default scoped-VMEM limit on v5e and
    # leaves ample headroom inside v7x's 64 MiB physical VMEM (v6e: 128 MiB).
    vmem_budget = 12 * 1024 * 1024
    cap = vmem_budget // (2 * 2 * E * itemsize)
    cap = max(128, (cap // 128) * 128)
    block_b = int(min(block_b, cap))

    if B <= block_b:
        # Single block: block_shape equals the full (padded) array, so only the
        # sublane multiple-of-8 padding is needed.
        block_b = _round_up(max(B, 1), 8)
        B_pad = block_b
    else:
        # Multi-block: minor block dim must be a multiple of 128 lanes.
        block_b = _round_up(block_b, 128)
        B_pad = _round_up(B, block_b)

    # --- glue: pad indices to a whole number of tiles, then gather ---
    pad = B_pad - B
    u_pad = jnp.pad(u, (0, pad))          # pad with index 0 (always valid); padded rows are sliced off
    v_pad = jnp.pad(v, (0, pad))

    # Gather then present the batch on the lane axis: (E, B_pad).
    Ut = jnp.take(user_emb, u_pad, axis=0).T        # (E, B_pad)
    Vt = jnp.take(item_emb, v_pad, axis=0).T        # (E, B_pad)
    b_u = jnp.take(user_bias[:, 0], u_pad)[None, :]  # (1, B_pad)
    b_v = jnp.take(item_bias[:, 0], v_pad)[None, :]  # (1, B_pad)

    grid = (B_pad // block_b,)

    out = pl.pallas_call(
        mf_kernel,
        out_shape=jax.ShapeDtypeStruct((1, B_pad), out_dtype),
        grid_spec=pltpu.PrefetchScalarGridSpec(
            num_scalar_prefetch=0,
            grid=grid,
            in_specs=[
                pl.BlockSpec((E, block_b), lambda i: (0, i)),
                pl.BlockSpec((E, block_b), lambda i: (0, i)),
                pl.BlockSpec((1, block_b), lambda i: (0, i)),
                pl.BlockSpec((1, block_b), lambda i: (0, i)),
            ],
            out_specs=pl.BlockSpec((1, block_b), lambda i: (0, i)),
        ),
        compiler_params=pltpu.CompilerParams(
            # Batch axis is independent: lets Mosaic shard grid steps across the
            # two TensorCores on v7x (neutral on single-TC v5e/v6e).
            dimension_semantics=("parallel",),
        ),
    )(Ut, Vt, b_u, b_v)

    return out[0, :B]                     # (B,) -- matches .squeeze()


def init_mf_params(key, num_users, num_items, emb_size):
    """Deterministic init matching the PyTorch __init__ ranges."""
    k1, k2, k3, k4 = jax.random.split(key, 4)
    user_emb = jax.random.uniform(k1, (num_users, emb_size), jnp.float32, -0.05, 0.05)
    item_emb = jax.random.uniform(k2, (num_items, emb_size), jnp.float32, -0.05, 0.05)
    user_bias = jax.random.uniform(k3, (num_users, 1), jnp.float32, -0.01, 0.01)
    item_bias = jax.random.uniform(k4, (num_items, 1), jnp.float32, -0.01, 0.01)
    return user_emb, item_emb, user_bias, item_bias


if __name__ == "__main__":
    num_users, num_items, emb_size = 64, 128, 100   # emb_size matches the PyTorch default
    batch = 10                                      # deliberately NOT a multiple of 8: exercises padded tail

    key = jax.random.PRNGKey(0)
    kp, ku, kv = jax.random.split(key, 3)
    user_emb, item_emb, user_bias, item_bias = init_mf_params(
        kp, num_users, num_items, emb_size
    )
    u = jax.random.randint(ku, (batch,), 0, num_users, dtype=jnp.int32)
    v = jax.random.randint(kv, (batch,), 0, num_items, dtype=jnp.int32)

    out = mf_forward(u, v, user_emb, item_emb, user_bias, item_bias)
    out = jax.block_until_ready(out)

    # pure-JAX reference check
    U = user_emb[u]
    V = item_emb[v]
    ref = (U * V).sum(axis=1) + user_bias[u, 0] + item_bias[v, 0]
    assert out.shape == (batch,)
    assert jnp.allclose(out, ref, atol=1e-5, rtol=1e-5), "mismatch vs JAX reference"

    print("KERNEL_OK")
</pallas_src>

<mosaic_0001>
module attributes {stable_mosaic.version = 11 : i64} {
  func.func @mf_kernel(%arg0: i32, %arg1: memref<100x16xf32, #tpu.memory_space<vmem>>, %arg2: memref<100x16xf32, #tpu.memory_space<vmem>>, %arg3: memref<1x16xf32, #tpu.memory_space<vmem>>, %arg4: memref<1x16xf32, #tpu.memory_space<vmem>>, %arg5: memref<1x16xf32, #tpu.memory_space<vmem>>) attributes {dimension_semantics = [#tpu.dimension_semantics<parallel>], iteration_bounds = array<i64: 1>, scalar_prefetch = 0 : i64, scratch_operands = 0 : i64, tpu.core_type = #tpu.core_type<tc>, window_params = [{transform_indices = @transform_0, window_bounds = array<i64: 100, 16>}, {transform_indices = @transform_1, window_bounds = array<i64: 100, 16>}, {transform_indices = @transform_2, window_bounds = array<i64: 1, 16>}, {transform_indices = @transform_3, window_bounds = array<i64: 1, 16>}, {transform_indices = @transform_4, window_bounds = array<i64: 1, 16>}]} {
    %c0 = arith.constant 0 : index
    %c0_0 = arith.constant 0 : index
    %0 = vector.load %arg1[%c0, %c0_0] : memref<100x16xf32, #tpu.memory_space<vmem>>, vector<100x16xf32>
    %c0_1 = arith.constant 0 : index
    %c0_2 = arith.constant 0 : index
    %1 = vector.load %arg2[%c0_1, %c0_2] : memref<100x16xf32, #tpu.memory_space<vmem>>, vector<100x16xf32>
    %2 = arith.mulf %0, %1 : vector<100x16xf32>
    %cst = arith.constant dense<0.000000e+00> : vector<16xf32>
    %3 = vector.multi_reduction <add>, %2, %cst [0] : vector<100x16xf32> to vector<16xf32>
    %4 = vector.shape_cast %3 : vector<16xf32> to vector<1x16xf32>
    %c0_3 = arith.constant 0 : index
    %c0_4 = arith.constant 0 : index
    %5 = vector.load %arg3[%c0_3, %c0_4] : memref<1x16xf32, #tpu.memory_space<vmem>>, vector<1x16xf32>
    %6 = arith.addf %4, %5 : vector<1x16xf32>
    %c0_5 = arith.constant 0 : index
    %c0_6 = arith.constant 0 : index
    %7 = vector.load %arg4[%c0_5, %c0_6] : memref<1x16xf32, #tpu.memory_space<vmem>>, vector<1x16xf32>
    %8 = arith.addf %6, %7 : vector<1x16xf32>
    %c0_7 = arith.constant 0 : index
    %c0_8 = arith.constant 0 : index
    %9 = vector.load %arg5[%c0_7, %c0_8] : memref<1x16xf32, #tpu.memory_space<vmem>>, vector<1x16xf32>
    tpu.vector_store %arg5[%c0_7, %c0_8], %8 {strides = array<i32>} : memref<1x16xf32, #tpu.memory_space<vmem>>, vector<1x16xf32>,
    return
  }
  func.func @transform_0(%arg0: i32) -> (i32, i32) {
    %c0_i32 = arith.constant 0 : i32
    %c0_i32_0 = arith.constant 0 : i32
    return %c0_i32, %arg0 : i32, i32
  }
  func.func @transform_1(%arg0: i32) -> (i32, i32) {
    %c0_i32 = arith.constant 0 : i32
    %c0_i32_0 = arith.constant 0 : i32
    return %c0_i32, %arg0 : i32, i32
  }
  func.func @transform_2(%arg0: i32) -> (i32, i32) {
    %c0_i32 = arith.constant 0 : i32
    %c0_i32_0 = arith.constant 0 : i32
    return %c0_i32, %arg0 : i32, i32
  }
  func.func @transform_3(%arg0: i32) -> (i32, i32) {
    %c0_i32 = arith.constant 0 : i32
    %c0_i32_0 = arith.constant 0 : i32
    return %c0_i32, %arg0 : i32, i32
  }
  func.func @transform_4(%arg0: i32) -> (i32, i32) {
    %c0_i32 = arith.constant 0 : i32
    %c0_i32_0 = arith.constant 0 : i32
    return %c0_i32, %arg0 : i32, i32
  }
}

</mosaic_0001>

<bundles_post_ra>
// kernel: tpu_custom_call.1
= control target key start
LH: loop header
LB: loop body
LE: loop exit
PB: predicated region body
PF: predicated region fallthrough
CT: control target
= control target key end

     0   :  { %vm57_vm0 = vcmask 130048   ;;  %s264_s0 = inlined_call_operand.vmem [shape: f32[100,16], index: 0, kind: input, shape index: {}]   ;;  %s265_s1 = inlined_call_operand.vmem [shape: f32[100,16], index: 1, kind: input, shape index: {}]   ;;  %s266_s2 = inlined_call_operand.vmem [shape: f32[1,16], index: 2, kind: input, shape index: {}]   ;;  %s267_s3 = inlined_call_operand.vmem [shape: f32[1,16], index: 3, kind: input, shape index: {}]   ;;  %s268_s4 = inlined_call_operand.hbm [shape: f32[1,16], index: 4, kind: output, shape index: {}]  }
   0x1   :  { %v18_v0 = vld [vmem:[%s264_s0] sm:$0xff]  ;;  %v19_v1 = vld [vmem:[%s264_s0 + $0x8] sm:$0xff]  ;;  %v20_v2 = vld [vmem:[%s264_s0 + $0x10] sm:$0xff] }
   0x2   :  { %v21_v3 = vld [vmem:[%s264_s0 + $0x18] sm:$0xff]  ;;  %v22_v4 = vld [vmem:[%s264_s0 + $0x20] sm:$0xff]  ;;  %v32_v6 = vld [vmem:[%s265_s1 + $0x8] sm:$0xff] }
   0x3   :  { %v31_v5 = vld [vmem:[%s265_s1] sm:$0xff]  ;;  %v33_v7 = vld [vmem:[%s265_s1 + $0x10] sm:$0xff]  ;;  %v34_v8 = vld [vmem:[%s265_s1 + $0x18] sm:$0xff]  ;;  %v45_v11 = vmul.f32 %v32_v6, %v19_v1 }
   0x4   :  { %v35_v9 = vld [vmem:[%s265_s1 + $0x20] sm:$0xff]  ;;  %v44_v10 = vmul.f32 %v31_v5, %v18_v0  ;;  %v46_v12 = vmul.f32 %v33_v7, %v20_v2  ;;  %v47_v13 = vmul.f32 %v34_v8, %v21_v3  ;;  %v23_v14 = vld [vmem:[%s264_s0 + $0x28] sm:$0xff] }
   0x5   :  { %v36_v15 = vld [vmem:[%s265_s1 + $0x28] sm:$0xff]  ;;  %v48_v17 = vmul.f32 %v35_v9, %v22_v4  ;;  %v59_v18 = vsel %vm57_vm0, %v45_v11, 0.0 }
   0x6   :  { %v58_v16 = vsel %vm57_vm0, %v44_v10, 0.0 }
   0x7   :  { %9 = vsyncpa [#allocation3], 0  ;;  %v24_v19 = vld [vmem:[%s264_s0 + $0x30] sm:$0xff]  ;;  %v60_v21 = vadd.f32 %v59_v18, %v58_v16  ;;  %v61_v22 = vsel %vm57_vm0, %v46_v12, 0.0  ;;  %v49_v23 = vmul.f32 %v36_v15, %v23_v14  ;;  %v63_v24 = vsel %vm57_vm0, %v47_v13, 0.0  ;;  %v25_v25 = vld [vmem:[%s264_s0 + $0x38] sm:$0xff] }
   0x8   :  { %v37_v20 = vld [vmem:[%s265_s1 + $0x30] sm:$0xff]  ;;  %v38_v26 = vld [vmem:[%s265_s1 + $0x38] sm:$0xff]  ;;  %v65_v29 = vsel %vm57_vm0, %v48_v17, 0.0  ;;  %v26_v30 = vld [vmem:[%s264_s0 + $0x40] sm:$0xff]  ;;  %vm81_vm1 = vcmask 125952   ;;  %s139_s17 = smov [#allocation2]  }
   0x9   :  { %v62_v27 = vadd.f32 %v61_v22, %v60_v21  ;;  %v50_v28 = vmul.f32 %v37_v20, %v24_v19  ;;  %v39_v31 = vld [vmem:[%s265_s1 + $0x40] sm:$0xff]  ;;  %v51_v33 = vmul.f32 %v38_v26, %v25_v25  ;;  %v67_v34 = vsel %vm57_vm0, %v49_v23, 0.0  ;;  %v27_v35 = vld [vmem:[%s264_s0 + $0x48] sm:$0xff]  ;;  %v28_v40 = vld [vmem:[%s264_s0 + $0x50] sm:$0xff]  ;;  %s101_s18 = sshll.u32 %s139_s17, 4  ;;  %s103_s21 = sshll.u32 %s268_s4, 4  ;;  %s102_s18 = int_to_ptr.vmem [resolvable:$true] %s101_s18  ;;  %s104_s21 = int_to_ptr.hbm [resolvable:$true] %s103_s21 }
   0xa   :  { %v40_v36 = vld [vmem:[%s265_s1 + $0x48] sm:$0xff]  ;;  %v52_v38 = vmul.f32 %v39_v31, %v26_v30  ;;  %v41_v41 = vld [vmem:[%s265_s1 + $0x50] sm:$0xff]  ;;  %v29_v45 = vld [vmem:[%s264_s0 + $0x58] sm:$0xff]  ;;  %vm94_vm2 = vcmask 122880  }
   0xb   :  { %v64_v32 = vadd.f32 %v63_v24, %v62_v27  ;;  %v69_v39 = vsel %vm57_vm0, %v50_v28, 0.0  ;;  %v53_v43 = vmul.f32 %v40_v36, %v27_v35  ;;  %v71_v44 = vsel %vm57_vm0, %v51_v33, 0.0  ;;  %v42_v46 = vld [vmem:[%s265_s1 + $0x58] sm:$0xff]  ;;  %v30_v50 = vld [vmem:[%s264_s0 + $0x60] sm:$0xf] }
   0xc   :  { %v54_v48 = vmul.f32 %v41_v41, %v28_v40  ;;  %v73_v49 = vsel %vm57_vm0, %v52_v38, 0.0  ;;  %v43_v51 = vld [vmem:[%s265_s1 + $0x60] sm:$0xf]  ;;  %v55_v53 = vmul.f32 %v42_v46, %v29_v45 }
   0xd   :  { %v66_v37 = vadd.f32 %v65_v29, %v64_v32  ;;  %v75_v54 = vsel %vm57_vm0, %v53_v43, 0.0  ;;  %v56_v56 = vmul.f32 %v43_v51, %v30_v50  ;;  %v90_v5 = vld [vmem:[%s266_s2] sm:$0x1] }
   0xe   :  { %v77_v57 = vsel %vm57_vm0, %v54_v48, 0.0  ;;  %v79_v59 = vsel %vm57_vm0, %v55_v53, 0.0  ;;  %v92_v7 = vld [vmem:[%s267_s3] sm:$0x1] }
   0xf   :  { %v68_v42 = vadd.f32 %v67_v34, %v66_v37  ;;  %v82_v61 = vsel %vm81_vm1, %v56_v56, 0.0 }
  0x11   :  { %v70_v47 = vadd.f32 %v69_v39, %v68_v42 }
  0x13   :  { %v72_v52 = vadd.f32 %v71_v44, %v70_v47 }
  0x15   :  { %v74_v55 = vadd.f32 %v73_v49, %v72_v52 }
  0x17   :  { %v76_v58 = vadd.f32 %v75_v54, %v74_v55 }
  0x19   :  { %v78_v60 = vadd.f32 %v77_v57, %v76_v58 }
  0x1b   :  { %v80_v62 = vadd.f32 %v79_v59, %v78_v60 }
  0x1d   :  { %v83_v63 = vadd.f32 %v82_v61, %v80_v62 }
  0x1f   :  { %v84_v0 = vrot.slane %v83_v63, 4 }
  0x21   :  { %v85_v1 = vadd.f32 %v84_v0, %v83_v63 }
  0x23   :  { %v86_v2 = vrot.slane %v85_v1, 2 }
  0x25   :  { %v87_v3 = vadd.f32 %v86_v2, %v85_v1 }
  0x27   :  { %v88_v4 = vrot.slane %v87_v3, 1 }
  0x29   :  { %v89_v6 = vadd.f32 %v88_v4, %v87_v3 }
  0x2b   :  { %v91_v8 = vadd.f32 %v90_v5, %v89_v6 }
  0x2d   :  { %v93_v9 = vadd.f32 %v92_v7, %v91_v8 }
  0x2f   :  { %95 = vst.msk [vmem:[#allocation2] sm:$0x1] %vm94_vm2, %v93_v9 }
  0x30   :  { %106 = dma.vmem_to_hbm [thread:$0]  %s102_s18, 16, %s104_s21, [#allocation3]  }
  0x31   :  { %137 = dma.done.wait [#allocation3], 16  }
  0x32   :  { %138 = vsyncadd [#allocation3], 4294967280 }
  0x33   :  { %111 = vsyncpa [#allocation3], 1 }

</bundles_post_ra>
